<compile_context>
chip_gen: v5e
topology: v5e:2x2
jax: 0.10.0
libtpu: 0.0.40
codegen_flags: <defaults>
</compile_context>

<pallas_src>
import jax
import jax.numpy as jnp
from jax.experimental import pallas as pl
from jax.experimental.pallas import tpu as pltpu

# ---- problem sizes (small, consistent with the module) ----------------------
B = 2          # batch
S = 24         # total sequence length (first N_TOKENS positions are "soft")
N_TOKENS = 8   # number of learned soft-prompt tokens
S_IN = S - N_TOKENS
V = 256        # vocab size of the wte embedding
D = 128        # embedding dim (lane-dense)


def soft_embedding_kernel(ids_ref, wte_ref, learned_ref, o_ref):
    """Single invocation handles the whole batch.

    ids_ref     : (B*S_IN, 1)   int32   token ids (already sliced/reshaped)
    wte_ref     : (V, D)        float32 embedding table (whole, in VMEM)
    learned_ref : (N_TOKENS, D) float32 learned soft prompt
    o_ref       : (B, S, D)     float32 full output block
    """
    n_rows, _ = ids_ref.shape
    vocab, _ = wte_ref.shape
    n_prompt, emb_d = learned_ref.shape
    batch = o_ref.shape[0]
    s_in = n_rows // batch

    # Embedding gather as one fused one-hot @ table on the MXU.
    ids = ids_ref[...]                                                   # (B*S_IN, 1)
    vocab_iota = jax.lax.broadcasted_iota(jnp.int32, (n_rows, vocab), 1)  # (B*S_IN, V)
    one_hot = (ids == vocab_iota).astype(jnp.float32)                    # (B*S_IN, V)
    emb = jnp.dot(one_hot, wte_ref[...],
                  preferred_element_type=jnp.float32)                    # (B*S_IN, D)

    # Concatenation along the sequence axis as two sublane-aligned, lane-dense
    # slabs (N_TOKENS and S_IN are both multiples of 8).
    learned_b = jnp.broadcast_to(learned_ref[...][None, :, :],
                                 (batch, n_prompt, emb_d))
    o_ref[:, :n_prompt, :] = learned_b.astype(o_ref.dtype)
    o_ref[:, n_prompt:, :] = emb.reshape(batch, s_in, emb_d).astype(o_ref.dtype)


def soft_embedding_forward(tokens, wte_weight, learned_embedding):
    """tokens: (B, S) int32; wte_weight: (V, D) f32; learned: (N_TOKENS, D) f32."""
    batch, seq = tokens.shape
    n_prompt, emb_d = learned_embedding.shape
    s_in = seq - n_prompt

    # Layout plumbing in the wrapper (cheap XLA ops): drop the ignored
    # soft-prompt token positions and present ids as a sublane-major column so
    # the kernel needs no cross-lane relayout.
    ids = tokens[:, n_prompt:].reshape(batch * s_in, 1).astype(jnp.int32)

    return pl.pallas_call(
        soft_embedding_kernel,
        out_shape=jax.ShapeDtypeStruct((batch, seq, emb_d), jnp.float32),
        in_specs=[
            pl.BlockSpec(memory_space=pltpu.MemorySpace.VMEM),   # ids column
            pl.BlockSpec(memory_space=pltpu.MemorySpace.VMEM),   # wte table (single copy)
            pl.BlockSpec(memory_space=pltpu.MemorySpace.VMEM),   # learned prompt
        ],
        out_specs=pl.BlockSpec(memory_space=pltpu.MemorySpace.VMEM),
    )(ids, wte_weight, learned_embedding)


if __name__ == "__main__":
    key = jax.random.PRNGKey(0)
    k_wte, k_tok = jax.random.split(key, 2)

    # Deterministic "wte" embedding table (stand-in for nn.Embedding weight).
    wte_weight = jax.random.normal(k_wte, (V, D), dtype=jnp.float32) * 0.02

    # initialize_from_vocab=True path: learned embedding = wte rows of some
    # deterministic init token ids (tiled/truncated to n_tokens).
    init_token_ids = jnp.arange(N_TOKENS, dtype=jnp.int32) % V
    learned_embedding = wte_weight[init_token_ids]                 # (N_TOKENS, D)

    # Input tokens (first N_TOKENS positions are placeholders, ignored by forward).
    tokens = jax.random.randint(k_tok, (B, S), 0, V, dtype=jnp.int32)

    out = soft_embedding_forward(tokens, wte_weight, learned_embedding)
    out = jax.block_until_ready(out)

    # Pure-JAX reference of the PyTorch forward.
    ref_input_emb = wte_weight[tokens[:, N_TOKENS:]]               # (B, S_IN, D)
    ref_learned = jnp.broadcast_to(learned_embedding[None], (B, N_TOKENS, D))
    ref = jnp.concatenate([ref_learned, ref_input_emb], axis=1)    # (B, S, D)

    assert out.shape == (B, S, D), out.shape
    assert jnp.allclose(out, ref, atol=1e-5, rtol=1e-5), "mismatch vs reference"

    print("KERNEL_OK")
</pallas_src>

<mosaic_0001>
module attributes {stable_mosaic.version = 11 : i64} {
  func.func @soft_embedding_kernel(%arg0: memref<32x1xi32, #tpu.memory_space<vmem>>, %arg1: memref<256x128xf32, #tpu.memory_space<vmem>>, %arg2: memref<8x128xf32, #tpu.memory_space<vmem>>, %arg3: memref<2x24x128xf32, #tpu.memory_space<vmem>>) attributes {dimension_semantics = [], scalar_prefetch = 0 : i64, scratch_operands = 0 : i64, tpu.core_type = #tpu.core_type<tc>} {
    %c0 = arith.constant 0 : index
    %c0_0 = arith.constant 0 : index
    %0 = vector.load %arg0[%c0, %c0_0] : memref<32x1xi32, #tpu.memory_space<vmem>>, vector<32x1xi32>
    %1 = tpu.iota {dimensions = array<i32: 1>} : vector<32x256xi32>
    %2 = vector.broadcast %0 : vector<32x1xi32> to vector<32x256xi32>
    %3 = arith.cmpi eq, %2, %1 : vector<32x256xi32>
    %4 = arith.extui %3 : vector<32x256xi1> to vector<32x256xi32>
    %5 = arith.sitofp %4 : vector<32x256xi32> to vector<32x256xf32>
    %c0_1 = arith.constant 0 : index
    %c0_2 = arith.constant 0 : index
    %6 = vector.load %arg1[%c0_1, %c0_2] : memref<256x128xf32, #tpu.memory_space<vmem>>, vector<256x128xf32>
    %cst = arith.constant dense<0.000000e+00> : vector<32x128xf32>
    %7 = tpu.matmul %5, %6, %cst {dimension_numbers = #tpu.dot_dimension_numbers<[1], [0], [0], [1], [0, 0, 1, 1], [], []>} : vector<32x256xf32>, vector<256x128xf32>, vector<32x128xf32> -> vector<32x128xf32>
    %c0_3 = arith.constant 0 : index
    %c0_4 = arith.constant 0 : index
    %8 = vector.load %arg2[%c0_3, %c0_4] : memref<8x128xf32, #tpu.memory_space<vmem>>, vector<8x128xf32>
    %9 = vector.shape_cast %8 : vector<8x128xf32> to vector<1x8x128xf32>
    %10 = vector.shape_cast %9 : vector<1x8x128xf32> to vector<1x8x128xf32>
    %11 = vector.broadcast %10 : vector<1x8x128xf32> to vector<2x8x128xf32>
    %c0_5 = arith.constant 0 : index
    %c0_6 = arith.constant 0 : index
    %c0_7 = arith.constant 0 : index
    %12 = vector.load %arg3[%c0_5, %c0_6, %c0_7] : memref<2x24x128xf32, #tpu.memory_space<vmem>>, vector<2x8x128xf32>
    tpu.vector_store %arg3[%c0_5, %c0_6, %c0_7], %11 {strides = array<i32>} : memref<2x24x128xf32, #tpu.memory_space<vmem>>, vector<2x8x128xf32>,
    %13 = vector.shape_cast %7 : vector<32x128xf32> to vector<2x16x128xf32>
    %c0_8 = arith.constant 0 : index
    %c8 = arith.constant 8 : index
    %c0_9 = arith.constant 0 : index
    %14 = vector.load %arg3[%c0_8, %c8, %c0_9] : memref<2x24x128xf32, #tpu.memory_space<vmem>>, vector<2x16x128xf32>
    tpu.vector_store %arg3[%c0_8, %c8, %c0_9], %13 {strides = array<i32>} : memref<2x24x128xf32, #tpu.memory_space<vmem>>, vector<2x16x128xf32>,
    return
  }
}

</mosaic_0001>

<bundles_post_ra>
// kernel: tpu_custom_call.1
= control target key start
LH: loop header
LB: loop body
LE: loop exit
PB: predicated region body
PF: predicated region fallthrough
CT: control target
= control target key end

     0   :  { %8 = vsyncpa [#allocation3], 0  ;;  %s351_s0 = inlined_call_operand.vmem [shape: s32[32,1], index: 0, kind: input, shape index: {}]   ;;  %s352_s1 = inlined_call_operand.hbm [shape: f32[256,128], index: 1, kind: input, shape index: {}]   ;;  %s353_s2 = inlined_call_operand.vmem [shape: f32[8,128], index: 2, kind: input, shape index: {}]   ;;  %s354_s3 = inlined_call_operand.hbm [shape: f32[2,24,128], index: 3, kind: output, shape index: {}]  }
   0x1   :  { %9 = vsyncpa [#allocation4], 0  ;;  %s16_s14 = sshll.u32 %s352_s1, 4  ;;  %s298_s15 = smov [#allocation2]   ;;  %s17_s14 = int_to_ptr.hbm [resolvable:$true] %s16_s14 }
   0x2   :  { %s18_s16 = sshll.u32 %s298_s15, 4  ;;  %s299_s17 = smov 128   ;;  %s19_s16 = int_to_ptr.vmem [resolvable:$true] %s18_s16 }
   0x3   :  { %s300_s18 = smov 8  }
   0x4   :  { %24 = dma.hbm_to_vmem [thread:$0]  %s17_s14, 4096, %s19_s16, [#allocation3], %s299_s17, %s299_s17, %s300_s18  }
   0x5   :  { %294 = dma.done.wait [#allocation3], 4096  }
   0x6   :  { %295 = vsyncadd [#allocation3], 4294963200  ;;  %v301_v0 = vmov 0   ;;  %v34_v1 = vld [vmem:[%s351_s0 + $0x18] sm:$0xff]  ;;  %v33_v2 = vld [vmem:[%s351_s0 + $0x10] sm:$0xff]  ;;  %v35_v37 = vlaneseq  ;;  %v302_v41 = vmov 1.0  }
   0x7   :  { %245 = vset.pattern.permute.xlu1 %v301_v0  ;;  %244 = vset.pattern.permute.xlu0 %v301_v0  ;;  %v89_v3 = vld [vmem:[#allocation2 + $0x78] sm:$0xff]  ;;  %v88_v5 = vld [vmem:[#allocation2 + $0x70] sm:$0xff]  ;;  %v87_v7 = vld [vmem:[#allocation2 + $0x68] sm:$0xff]  ;;  %s303_s27 = smov [#allocation5]   ;;  %s177_s4 = sshll.u32 %s354_s3, 4  ;;  %s178_s4 = int_to_ptr.hbm [resolvable:$true] %s177_s4 }
   0x8   :  { %48 = vperm.xlu1 %245, %v34_v1   ;;  %45 = vperm.xlu0 %244, %v33_v2   ;;  %v105_v4 = vld [vmem:[#allocation2 + $0xf8] sm:$0xff]  ;;  %v104_v6 = vld [vmem:[#allocation2 + $0xf0] sm:$0xff]  ;;  %v103_v8 = vld [vmem:[#allocation2 + $0xe8] sm:$0xff]  ;;  %v36_v38 = vand.u32 127, %v35_v37  ;;  %s175_s28 = sshll.u32 %s303_s27, 4  ;;  %s176_s28 = int_to_ptr.vmem [resolvable:$true] %s175_s28 }
   0x9   :  { %206 = vmatpush.msra.mxu2 %v89_v3  ;;  %222 = vmatpush.msra.mxu3 %v105_v4  ;;  %v86_v9 = vld [vmem:[#allocation2 + $0x60] sm:$0xff]  ;;  %v32_v11 = vld [vmem:[%s351_s0 + $0x8] sm:$0xff]  ;;  %v85_v13 = vld [vmem:[#allocation2 + $0x58] sm:$0xff] }
   0xa   :  { %106 = vmatpush.msra.mxu0 %v89_v3  ;;  %135 = vmatpush.msra.mxu1 %v105_v4  ;;  %v102_v10 = vld [vmem:[#allocation2 + $0xe0] sm:$0xff]  ;;  %v101_v14 = vld [vmem:[#allocation2 + $0xd8] sm:$0xff]  ;;  %v84_v15 = vld [vmem:[#allocation2 + $0x50] sm:$0xff]  ;;  %v37_v39 = vadd.s32 128, %v36_v38 }
   0xb   :  { %207 = vmatpush.msra.mxu2 %v88_v5  ;;  %223 = vmatpush.msra.mxu3 %v104_v6  ;;  %v31_v12 = vld [vmem:[%s351_s0] sm:$0xff]  ;;  %v100_v16 = vld [vmem:[#allocation2 + $0xd0] sm:$0xff]  ;;  %v83_v17 = vld [vmem:[#allocation2 + $0x48] sm:$0xff] }
   0xc   :  { %107 = vmatpush.msra.mxu0 %v88_v5  ;;  %136 = vmatpush.msra.mxu1 %v104_v6  ;;  %v99_v18 = vld [vmem:[#allocation2 + $0xc8] sm:$0xff]  ;;  %v82_v19 = vld [vmem:[#allocation2 + $0x40] sm:$0xff]  ;;  %v81_v21 = vld [vmem:[#allocation2 + $0x38] sm:$0xff] }
   0xd   :  { %208 = vmatpush.msra.mxu2 %v87_v7  ;;  %224 = vmatpush.msra.mxu3 %v103_v8  ;;  %v98_v20 = vld [vmem:[#allocation2 + $0xc0] sm:$0xff]  ;;  %v97_v22 = vld [vmem:[#allocation2 + $0xb8] sm:$0xff]  ;;  %v80_v23 = vld [vmem:[#allocation2 + $0x30] sm:$0xff] }
   0xe   :  { %108 = vmatpush.msra.mxu0 %v87_v7  ;;  %137 = vmatpush.msra.mxu1 %v103_v8  ;;  %v96_v24 = vld [vmem:[#allocation2 + $0xb0] sm:$0xff]  ;;  %v79_v25 = vld [vmem:[#allocation2 + $0x28] sm:$0xff]  ;;  %v78_v27 = vld [vmem:[#allocation2 + $0x20] sm:$0xff] }
   0xf   :  { %209 = vmatpush.msra.mxu2 %v86_v9  ;;  %225 = vmatpush.msra.mxu3 %v102_v10  ;;  %v95_v26 = vld [vmem:[#allocation2 + $0xa8] sm:$0xff]  ;;  %v94_v28 = vld [vmem:[#allocation2 + $0xa0] sm:$0xff]  ;;  %v77_v29 = vld [vmem:[#allocation2 + $0x18] sm:$0xff] }
  0x10   :  { %42 = vperm.xlu1 %245, %v32_v11   ;;  %39 = vperm.xlu0 %244, %v31_v12   ;;  %v93_v30 = vld [vmem:[#allocation2 + $0x98] sm:$0xff]  ;;  %v76_v31 = vld [vmem:[#allocation2 + $0x10] sm:$0xff]  ;;  %v75_v33 = vld [vmem:[#allocation2 + $0x8] sm:$0xff] }
  0x11   :  { %210 = vmatpush.msra.mxu2 %v85_v13  ;;  %226 = vmatpush.msra.mxu3 %v101_v14  ;;  %v92_v32 = vld [vmem:[#allocation2 + $0x90] sm:$0xff]  ;;  %v91_v34 = vld [vmem:[#allocation2 + $0x88] sm:$0xff]  ;;  %v74_v35 = vld [vmem:[#allocation2] sm:$0xff] }
  0x12   :  { %109 = vmatpush.msra.mxu0 %v86_v9  ;;  %138 = vmatpush.msra.mxu1 %v102_v10  ;;  %v90_v36 = vld [vmem:[#allocation2 + $0x80] sm:$0xff] }
  0x13   :  { %211 = vmatpush.msra.mxu2 %v84_v15  ;;  %227 = vmatpush.msra.mxu3 %v100_v16  ;;  %v164_v45 = vld [vmem:[%s353_s2] sm:$0xff] }
  0x14   :  { %110 = vmatpush.msra.mxu0 %v85_v13  ;;  %139 = vmatpush.msra.mxu1 %v101_v14  ;;  %165 = vst [vmem:[#allocation5] sm:$0xff] %v164_v45 }
  0x15   :  { %212 = vmatpush.msra.mxu2 %v83_v17  ;;  %228 = vmatpush.msra.mxu3 %v99_v18  ;;  %166 = vst [vmem:[#allocation5 + $0x18] sm:$0xff] %v164_v45 }
  0x16   :  { %111 = vmatpush.msra.mxu0 %v84_v15  ;;  %140 = vmatpush.msra.mxu1 %v100_v16 }
  0x17   :  { %213 = vmatpush.msra.mxu2 %v82_v19  ;;  %229 = vmatpush.msra.mxu3 %v98_v20 }
  0x18   :  { %112 = vmatpush.msra.mxu0 %v83_v17  ;;  %141 = vmatpush.msra.mxu1 %v99_v18 }
  0x19   :  { %214 = vmatpush.msra.mxu2 %v81_v21  ;;  %230 = vmatpush.msra.mxu3 %v97_v22 }
  0x1a   :  { %113 = vmatpush.msra.mxu0 %v82_v19  ;;  %142 = vmatpush.msra.mxu1 %v98_v20 }
  0x1b   :  { %215 = vmatpush.msra.mxu2 %v80_v23  ;;  %231 = vmatpush.msra.mxu3 %v96_v24 }
  0x1c   :  { %114 = vmatpush.msra.mxu0 %v81_v21  ;;  %143 = vmatpush.msra.mxu1 %v97_v22 }
  0x1d   :  { %216 = vmatpush.msra.mxu2 %v79_v25  ;;  %232 = vmatpush.msra.mxu3 %v95_v26 }
  0x1e   :  { %115 = vmatpush.msra.mxu0 %v80_v23  ;;  %144 = vmatpush.msra.mxu1 %v96_v24 }
  0x1f   :  { %217 = vmatpush.msra.mxu2 %v78_v27  ;;  %233 = vmatpush.msra.mxu3 %v94_v28 }
  0x20   :  { %116 = vmatpush.msra.mxu0 %v79_v25  ;;  %145 = vmatpush.msra.mxu1 %v95_v26 }
  0x21   :  { %218 = vmatpush.msra.mxu2 %v77_v29  ;;  %234 = vmatpush.msra.mxu3 %v93_v30 }
  0x22   :  { %117 = vmatpush.msra.mxu0 %v78_v27  ;;  %146 = vmatpush.msra.mxu1 %v94_v28 }
  0x23   :  { %219 = vmatpush.msra.mxu2 %v76_v31  ;;  %235 = vmatpush.msra.mxu3 %v92_v32 }
  0x24   :  { %118 = vmatpush.msra.mxu0 %v77_v29  ;;  %147 = vmatpush.msra.mxu1 %v93_v30 }
  0x25   :  { %220 = vmatpush.msra.mxu2 %v75_v33  ;;  %236 = vmatpush.msra.mxu3 %v91_v34 }
  0x26   :  { %119 = vmatpush.msra.mxu0 %v76_v31  ;;  %148 = vmatpush.msra.mxu1 %v92_v32 }
  0x27   :  { %221 = vmatpush.msra.mxu2 %v74_v35  ;;  %237 = vmatpush.msra.mxu3 %v90_v36 }
  0x28   :  { %120 = vmatpush.msra.mxu0 %v75_v33  ;;  %149 = vmatpush.msra.mxu1 %v91_v34 }
  0x2a   :  { %121 = vmatpush.msra.mxu0 %v74_v35  ;;  %150 = vmatpush.msra.mxu1 %v90_v36 }
  0x7a   :  { %v46_v40 = vpop.permute.xlu0 %45  ;;  %v49_v42 = vpop.permute.xlu1 %48 }
  0x7b   :  { %vm54_vm0 = vcmp.eq.s32.totalorder %v46_v40, %v36_v38  ;;  %vm55_vm1 = vcmp.eq.s32.totalorder %v46_v40, %v37_v39  ;;  %vm56_vm2 = vcmp.eq.s32.totalorder %v49_v42, %v36_v38  ;;  %vm57_vm3 = vcmp.eq.s32.totalorder %v49_v42, %v37_v39 }
  0x7c   :  { %200 = vmatmul.msk.f32.vlgmr.msra.gmra.mxu2 %vm54_vm0, %v302_v41  ;;  %204 = vmatmul.msk.f32.vlgmr.msra.gmra.mxu3 %vm55_vm1, %v302_v41 }
  0x82   :  { %v40_v43 = vpop.permute.xlu0 %39  ;;  %v43_v44 = vpop.permute.xlu1 %42 }
  0x83   :  { %vm50_vm4 = vcmp.eq.s32.totalorder %v40_v43, %v36_v38  ;;  %vm51_vm5 = vcmp.eq.s32.totalorder %v40_v43, %v37_v39  ;;  %vm52_vm6 = vcmp.eq.s32.totalorder %v43_v44, %v36_v38  ;;  %vm53_vm7 = vcmp.eq.s32.totalorder %v43_v44, %v37_v39 }
  0x84   :  { %198 = vmatmul.msk.f32.vlgmr.msra.gmra.mxu0 %vm50_vm4, %v302_v41  ;;  %201 = vmatmul.msk.f32.gmra.mxu2 %vm56_vm2, %v302_v41 }
  0x85   :  { %202 = vmatmul.msk.f32.vlgmr.msra.gmra.mxu1 %vm51_vm5, %v302_v41  ;;  %205 = vmatmul.msk.f32.gmra.mxu3 %vm57_vm3, %v302_v41 }
  0x8c   :  { %199 = vmatmul.msk.f32.gmra.mxu0 %vm52_vm6, %v302_v41 }
  0x8d   :  { %203 = vmatmul.msk.f32.gmra.mxu1 %vm53_vm7, %v302_v41 }
  0xff   :  { %v129_v46 = vpop.f32.mrf.mxu2  ;;  %v158_v47 = vpop.f32.mrf.mxu3 }
 0x100   :  { %v159_v48 = vadd.f32 %v158_v47, %v129_v46 }
 0x101   :  { %v123_v49 = vpop.f32.mrf.mxu0 }
 0x102   :  { %169 = vst [vmem:[#allocation5 + $0x20] sm:$0xff] %v159_v48  ;;  %v152_v50 = vpop.f32.mrf.mxu1 }
 0x103   :  { %v153_v51 = vadd.f32 %v152_v50, %v123_v49 }
 0x105   :  { %167 = vst [vmem:[#allocation5 + $0x8] sm:$0xff] %v153_v51 }
 0x107   :  { %v132_v52 = vpop.f32.mrf.mxu2 }
 0x108   :  { %v161_v53 = vpop.f32.mrf.mxu3 }
 0x109   :  { %v162_v54 = vadd.f32 %v161_v53, %v132_v52  ;;  %v126_v55 = vpop.f32.mrf.mxu0 }
 0x10a   :  { %v155_v56 = vpop.f32.mrf.mxu1 }
 0x10b   :  { %170 = vst [vmem:[#allocation5 + $0x28] sm:$0xff] %v162_v54  ;;  %v156_v57 = vadd.f32 %v155_v56, %v126_v55 }
 0x10d   :  { %168 = vst [vmem:[#allocation5 + $0x10] sm:$0xff] %v156_v57 }
 0x10e   :  { %183 = dma.vmem_to_hbm [thread:$0]  %s176_s28, 768, %s178_s4, [#allocation4], %s299_s17, %s299_s17, %s300_s18  }
 0x10f   :  { %296 = dma.done.wait [#allocation4], 768  }
 0x110   :  { %297 = vsyncadd [#allocation4], 4294966528 }
 0x111   :  { %188 = vsyncpa [#allocation3], 1 }
 0x112   :  { %189 = vsyncpa [#allocation4], 1 }

</bundles_post_ra>
